<compile_context>
chip_gen: v5e
topology: v5e:2x2
jax: 0.10.0
libtpu: 0.0.40
codegen_flags: <defaults>
</compile_context>

<pallas_src>
import jax
import jax.numpy as jnp
from jax.experimental import pallas as pl
from jax.experimental.pallas import tpu as pltpu

BN_EPS = 1e-5
LEAKY_SLOPE = 0.01


def _make_fused_kernel(n, cin, cout, kh, kw, oh, ow, row_window):
    """One kernel: phase 0 = conv + stats accumulate, phase 1 = BN+bias+LeakyReLU."""
    ohw = oh * ow
    inv_m = 1.0 / float(n * ohw)

    def kernel(x_ref, w_ref, b_ref, o_ref, y_buf, stats, coef):
        # x_ref : (KW,    1, Cin, HS*OW) bf16   if row_window (stride == 1)
        #         (KH*KW, 1, Cin, OH*OW) bf16   otherwise
        # w_ref : (Cout, KH*KW*Cin)      bf16   K ordered (kh, kw, cin)
        # b_ref : (Cout, 1)              f32    Bias2d
        # o_ref : (1, Cout, OH*OW)       f32
        # y_buf : (N, Cout, OH*OW)       f32    scratch, persistent across grid
        # stats : (2, Cout, 1)           f32    scratch: [sum, sum of squares]
        # coef  : (2, Cout, 1)           f32    scratch: [scale, shift]
        phase = pl.program_id(0)
        img = pl.program_id(1)

        @pl.when(phase == 0)
        def _conv_and_stats():
            # Merge every tap into one K = KH*KW*Cin contraction (single MXU dot).
            if row_window:
                slab = x_ref[:, 0, :, :]                            # (KW, Cin, HS*OW)
                # Row shift i == static lane-offset window of the flattened slab.
                # TODO(synk): offsets i*OW are not 128-aligned; if bundle dumps show
                # relayout cost at large Cin, do the row shift with pltpu.roll.
                taps = [
                    slab[:, :, i * ow:i * ow + ohw].reshape(kw * cin, ohw)
                    for i in range(kh)
                ]
                xk = jnp.concatenate(taps, axis=0)                  # (KH*KW*Cin, OHW)
            else:
                xk = x_ref[:, 0, :, :].reshape(kh * kw * cin, ohw)
            y = jnp.dot(w_ref[...], xk, preferred_element_type=jnp.float32)
            y_buf[img] = y
            s = jnp.sum(y, axis=-1, keepdims=True)                  # (Cout, 1)
            sq = jnp.sum(y * y, axis=-1, keepdims=True)

            @pl.when(img == 0)
            def _():
                stats[0] = s
                stats[1] = sq

            @pl.when(img != 0)
            def _():
                stats[0] = stats[0] + s
                stats[1] = stats[1] + sq

        @pl.when(phase == 1)
        def _normalize_bias_lrelu():
            @pl.when(img == 0)
            def _():
                mean = stats[0] * inv_m
                # Biased variance (PyTorch BN training-mode normalization).
                # TODO(synk): E[y^2]-E[y]^2 can cancel for large activation means;
                # switch to a centered second pass if reused as a generic layer.
                var = stats[1] * inv_m - mean * mean
                inv = jax.lax.rsqrt(var + BN_EPS)
                coef[0] = inv
                coef[1] = b_ref[...] - mean * inv

            z = y_buf[img] * coef[0] + coef[1]                      # BN + Bias2d folded
            o_ref[0] = jnp.where(z >= 0, z, LEAKY_SLOPE * z)

    return kernel


def leaky_relu_bn_ns_conv2d(x, conv_w, conv_b, bias2d, *, stride, padding):
    """x: (N, Cin, H, W) NCHW; conv_w: (Cout, Cin, KH, KW); conv_b, bias2d: (Cout,).
    Returns (N, Cout, OH, OW) NCHW float32 (BatchNorm in training mode, batch stats)."""
    del conv_b  # cancels exactly under affine-less, training-mode BatchNorm
    n, cin, h, w = x.shape
    cout, _, kh, kw = conv_w.shape
    oh = (h + 2 * padding - kh) // stride + 1
    ow = (w + 2 * padding - kw) // stride + 1
    ohw = oh * ow

    # bf16 cast BEFORE padding / column shifts: halves wrapper prep bytes.
    xp = jnp.pad(x.astype(jnp.bfloat16),
                 ((0, 0), (0, 0), (padding, padding), (padding, padding)))

    if stride == 1:
        # KW column-shifted copies only; KH row shifts happen inside the kernel.
        hs = oh + kh - 1                     # == padded height
        cols = [xp[:, :, :hs, j:j + ow] for j in range(kw)]
        xsh = jnp.stack(cols, axis=0).reshape(kw, n, cin, hs * ow)
        s_dim, l_dim, row_window = kw, hs * ow, True
    else:
        # TODO(synk): stride > 1 row windows are not lane-contiguous; fall back to
        # fully pre-shifted slabs (still far less than a 9x f32 im2col).
        slabs = [xp[:, :, i:i + stride * (oh - 1) + 1:stride,
                        j:j + stride * (ow - 1) + 1:stride]
                 for i in range(kh) for j in range(kw)]
        xsh = jnp.stack(slabs, axis=0).reshape(kh * kw, n, cin, ohw)
        s_dim, l_dim, row_window = kh * kw, ohw, False

    # K ordered (kh, kw, cin) to match the in-kernel tap concatenation.
    w_r = (conv_w.transpose(0, 2, 3, 1)              # (Cout, KH, KW, Cin)
                 .reshape(cout, kh * kw * cin)
                 .astype(jnp.bfloat16))
    b_r = bias2d.astype(jnp.float32).reshape(cout, 1)

    kernel = _make_fused_kernel(n, cin, cout, kh, kw, oh, ow, row_window)

    x_block = (s_dim, 1, cin, l_dim)
    out_block_bytes = cout * ohw * 4
    # Double-buffered in/out blocks + persistent scratch + weights/bias (padded).
    vmem_bytes = (2 * s_dim * max(cin, 8) * ((l_dim + 127) // 128) * 128 * 2
                  + 2 * cout * 128 * 2 + 2 * cout * 128 * 4
                  + 2 * out_block_bytes + n * out_block_bytes
                  + 4 * cout * 128 * 4)
    vmem_limit = int(min(48 << 20, max(16 << 20, 2 * vmem_bytes)))

    flops = 2 * n * ohw * (cin * kh * kw) * cout
    bytes_accessed = xsh.size * 2 + w_r.size * 2 + b_r.size * 4 + n * out_block_bytes

    out = pl.pallas_call(
        kernel,
        out_shape=jax.ShapeDtypeStruct((n, cout, ohw), jnp.float32),
        grid=(2, n),
        in_specs=[
            # Phase 0: stream image i; phase 1: hold the last block (no re-fetch).
            pl.BlockSpec(x_block, lambda p, i: (0, i * (1 - p) + (n - 1) * p, 0, 0)),
            pl.BlockSpec((cout, kh * kw * cin), lambda p, i: (0, 0)),
            pl.BlockSpec((cout, 1), lambda p, i: (0, 0)),
        ],
        # Phase-0 steps alias output block 0 (never written there); phase 1 writes
        # the real block i -> exactly one lane-dense writeback per image.
        out_specs=pl.BlockSpec((1, cout, ohw), lambda p, i: (i * p, 0, 0)),
        scratch_shapes=[
            pltpu.VMEM((n, cout, ohw), jnp.float32),   # un-normalized conv output
            pltpu.VMEM((2, cout, 1), jnp.float32),     # [sum, sum of squares]
            pltpu.VMEM((2, cout, 1), jnp.float32),     # [scale, shift]
        ],
        compiler_params=pltpu.CompilerParams(
            # BN batch statistics couple every image -> sequential grid.
            dimension_semantics=("arbitrary", "arbitrary"),
            vmem_limit_bytes=vmem_limit,
        ),
        cost_estimate=pl.CostEstimate(flops=flops, transcendentals=cout,
                                      bytes_accessed=bytes_accessed),
    )(xsh, w_r, b_r)

    # TODO(synk): BatchNorm2d running_mean / running_var buffer updates are not
    # reproduced (eval-mode parity would also resurrect the conv bias).
    # (N, Cout, OH*OW) is already NCHW-flattened -> reshape is free (no transpose).
    return out.reshape(n, cout, oh, ow)


if __name__ == "__main__":
    # Module config: LeakyReLUBNNSConv2d(n_in=4, n_out=8, kernel_size=3, stride=1, padding=1)
    N, CIN, H, W = 2, 4, 16, 16
    COUT, KH, KW = 8, 3, 3
    STRIDE, PAD = 1, 1

    key = jax.random.PRNGKey(0)
    k_x, k_w, k_b, k_b2 = jax.random.split(key, 4)

    x = jax.random.normal(k_x, (N, CIN, H, W), dtype=jnp.float32)
    # gaussian_weights_init: conv weight ~ N(0, 0.02)
    conv_w = 0.02 * jax.random.normal(k_w, (COUT, CIN, KH, KW), dtype=jnp.float32)
    conv_b = 0.05 * jax.random.normal(k_b, (COUT,), dtype=jnp.float32)
    # Bias2d: bias ~ N(0, 0.002)
    bias2d = 0.002 * jax.random.normal(k_b2, (COUT,), dtype=jnp.float32)

    out = leaky_relu_bn_ns_conv2d(x, conv_w, conv_b, bias2d, stride=STRIDE, padding=PAD)
    out = jax.block_until_ready(out)
    assert out.shape == (N, COUT, H, W), out.shape

    # Pure-JAX f32 reference (conv -> BN(train, affine=False) -> Bias2d -> LeakyReLU).
    ref_y = jax.lax.conv_general_dilated(
        x, conv_w, window_strides=(STRIDE, STRIDE),
        padding=[(PAD, PAD), (PAD, PAD)],
        dimension_numbers=("NCHW", "OIHW", "NCHW")) + conv_b.reshape(1, COUT, 1, 1)
    mu = jnp.mean(ref_y, axis=(0, 2, 3), keepdims=True)
    va = jnp.var(ref_y, axis=(0, 2, 3), keepdims=True)
    ref = (ref_y - mu) * jax.lax.rsqrt(va + BN_EPS) + bias2d.reshape(1, COUT, 1, 1)
    ref = jnp.where(ref >= 0, ref, LEAKY_SLOPE * ref)
    max_err = float(jnp.max(jnp.abs(out - ref)))
    assert max_err < 6e-2, f"max_err={max_err}"   # bf16 matmul inputs, f32 accumulate

    print("KERNEL_OK")
</pallas_src>

<mosaic_0001>
module attributes {stable_mosaic.version = 11 : i64} {
  func.func @kernel(%arg0: i32, %arg1: i32, %arg2: memref<3x1x4x288xbf16, #tpu.memory_space<vmem>>, %arg3: memref<8x36xbf16, #tpu.memory_space<vmem>>, %arg4: memref<8x1xf32, #tpu.memory_space<vmem>>, %arg5: memref<1x8x256xf32, #tpu.memory_space<vmem>>, %arg6: memref<2x8x256xf32, #tpu.memory_space<vmem>>, %arg7: memref<2x8x1xf32, #tpu.memory_space<vmem>>, %arg8: memref<2x8x1xf32, #tpu.memory_space<vmem>>) attributes {dimension_semantics = [#tpu.dimension_semantics<arbitrary>, #tpu.dimension_semantics<arbitrary>], iteration_bounds = array<i64: 2, 2>, scalar_prefetch = 0 : i64, scratch_operands = 3 : i64, tpu.core_type = #tpu.core_type<tc>, window_params = [{transform_indices = @transform_0, window_bounds = array<i64: 3, 1, 4, 288>}, {pipeline_mode = #tpu.pipeline_mode<synchronous>, transform_indices = @transform_1, window_bounds = array<i64: 8, 36>}, {pipeline_mode = #tpu.pipeline_mode<synchronous>, transform_indices = @transform_2, window_bounds = array<i64: 8, 1>}, {transform_indices = @transform_3, window_bounds = array<i64: 1, 8, 256>}]} {
    %c0_i32 = arith.constant 0 : i32
    %0 = arith.cmpi eq, %arg0, %c0_i32 : i32
    %1 = arith.extui %0 : i1 to i32
    %c0_i32_0 = arith.constant 0 : i32
    %2 = arith.cmpi ne, %1, %c0_i32_0 : i32
    scf.if %2 {
      %c0 = arith.constant 0 : index
      %c0_2 = arith.constant 0 : index
      %c0_3 = arith.constant 0 : index
      %c0_4 = arith.constant 0 : index
      %6 = vector.load %arg2[%c0, %c0_2, %c0_3, %c0_4] : memref<3x1x4x288xbf16, #tpu.memory_space<vmem>>, vector<3x1x4x288xbf16>
      %7 = vector.shape_cast %6 : vector<3x1x4x288xbf16> to vector<3x4x288xbf16>
      %8 = vector.extract_strided_slice %7 {offsets = [0, 0, 0], sizes = [3, 4, 256], strides = [1, 1, 1]} : vector<3x4x288xbf16> to vector<3x4x256xbf16>
      %9 = vector.shape_cast %8 : vector<3x4x256xbf16> to vector<12x256xbf16>
      %10 = vector.extract_strided_slice %7 {offsets = [0, 0, 16], sizes = [3, 4, 256], strides = [1, 1, 1]} : vector<3x4x288xbf16> to vector<3x4x256xbf16>
      %11 = vector.shape_cast %10 : vector<3x4x256xbf16> to vector<12x256xbf16>
      %12 = vector.extract_strided_slice %7 {offsets = [0, 0, 32], sizes = [3, 4, 256], strides = [1, 1, 1]} : vector<3x4x288xbf16> to vector<3x4x256xbf16>
      %13 = vector.shape_cast %12 : vector<3x4x256xbf16> to vector<12x256xbf16>
      %14 = tpu.concatenate %9, %11, %13 in 0 : vector<12x256xbf16>, vector<12x256xbf16>, vector<12x256xbf16> -> vector<36x256xbf16>
      %c0_5 = arith.constant 0 : index
      %c0_6 = arith.constant 0 : index
      %15 = vector.load %arg3[%c0_5, %c0_6] : memref<8x36xbf16, #tpu.memory_space<vmem>>, vector<8x36xbf16>
      %cst = arith.constant dense<0.000000e+00> : vector<8x256xf32>
      %16 = tpu.matmul %15, %14, %cst {dimension_numbers = #tpu.dot_dimension_numbers<[1], [0], [0], [1], [0, 0, 1, 1], [], []>} : vector<8x36xbf16>, vector<36x256xbf16>, vector<8x256xf32> -> vector<8x256xf32>
      %17 = arith.index_cast %arg1 : i32 to index
      %c0_7 = arith.constant 0 : index
      %c0_8 = arith.constant 0 : index
      %18 = vector.load %arg6[%17, %c0_7, %c0_8] : memref<2x8x256xf32, #tpu.memory_space<vmem>>, vector<1x8x256xf32>
      %19 = vector.shape_cast %18 : vector<1x8x256xf32> to vector<8x256xf32>
      %20 = vector.shape_cast %16 : vector<8x256xf32> to vector<1x8x256xf32>
      tpu.vector_store %arg6[%17, %c0_7, %c0_8], %20 {strides = array<i32>} : memref<2x8x256xf32, #tpu.memory_space<vmem>>, vector<1x8x256xf32>,
      %cst_9 = arith.constant dense<0.000000e+00> : vector<8xf32>
      %21 = vector.multi_reduction <add>, %16, %cst_9 [1] : vector<8x256xf32> to vector<8xf32>
      %22 = vector.shape_cast %21 : vector<8xf32> to vector<8x1xf32>
      %23 = arith.mulf %16, %16 : vector<8x256xf32>
      %cst_10 = arith.constant dense<0.000000e+00> : vector<8xf32>
      %24 = vector.multi_reduction <add>, %23, %cst_10 [1] : vector<8x256xf32> to vector<8xf32>
      %25 = vector.shape_cast %24 : vector<8xf32> to vector<8x1xf32>
      %c0_i32_11 = arith.constant 0 : i32
      %26 = arith.cmpi eq, %arg1, %c0_i32_11 : i32
      %27 = arith.extui %26 : i1 to i32
      %c0_i32_12 = arith.constant 0 : i32
      %28 = arith.cmpi ne, %27, %c0_i32_12 : i32
      scf.if %28 {
        %c0_15 = arith.constant 0 : index
        %c0_16 = arith.constant 0 : index
        %c0_17 = arith.constant 0 : index
        %32 = vector.load %arg7[%c0_15, %c0_16, %c0_17] : memref<2x8x1xf32, #tpu.memory_space<vmem>>, vector<1x8x1xf32>
        %33 = vector.shape_cast %32 : vector<1x8x1xf32> to vector<8x1xf32>
        %34 = vector.shape_cast %22 : vector<8x1xf32> to vector<1x8x1xf32>
        tpu.vector_store %arg7[%c0_15, %c0_16, %c0_17], %34 {strides = array<i32>} : memref<2x8x1xf32, #tpu.memory_space<vmem>>, vector<1x8x1xf32>,
        %c1 = arith.constant 1 : index
        %c0_18 = arith.constant 0 : index
        %c0_19 = arith.constant 0 : index
        %35 = vector.load %arg7[%c1, %c0_18, %c0_19] : memref<2x8x1xf32, #tpu.memory_space<vmem>>, vector<1x8x1xf32>
        %36 = vector.shape_cast %35 : vector<1x8x1xf32> to vector<8x1xf32>
        %37 = vector.shape_cast %25 : vector<8x1xf32> to vector<1x8x1xf32>
        tpu.vector_store %arg7[%c1, %c0_18, %c0_19], %37 {strides = array<i32>} : memref<2x8x1xf32, #tpu.memory_space<vmem>>, vector<1x8x1xf32>,
      } else {
      }
      %c0_i32_13 = arith.constant 0 : i32
      %29 = arith.cmpi ne, %arg1, %c0_i32_13 : i32
      %30 = arith.extui %29 : i1 to i32
      %c0_i32_14 = arith.constant 0 : i32
      %31 = arith.cmpi ne, %30, %c0_i32_14 : i32
      scf.if %31 {
        %c0_15 = arith.constant 0 : index
        %c0_16 = arith.constant 0 : index
        %c0_17 = arith.constant 0 : index
        %32 = vector.load %arg7[%c0_15, %c0_16, %c0_17] : memref<2x8x1xf32, #tpu.memory_space<vmem>>, vector<1x8x1xf32>
        %33 = vector.shape_cast %32 : vector<1x8x1xf32> to vector<8x1xf32>
        %34 = arith.addf %33, %22 : vector<8x1xf32>
        %c0_18 = arith.constant 0 : index
        %c0_19 = arith.constant 0 : index
        %c0_20 = arith.constant 0 : index
        %35 = vector.load %arg7[%c0_18, %c0_19, %c0_20] : memref<2x8x1xf32, #tpu.memory_space<vmem>>, vector<1x8x1xf32>
        %36 = vector.shape_cast %35 : vector<1x8x1xf32> to vector<8x1xf32>
        %37 = vector.shape_cast %34 : vector<8x1xf32> to vector<1x8x1xf32>
        tpu.vector_store %arg7[%c0_18, %c0_19, %c0_20], %37 {strides = array<i32>} : memref<2x8x1xf32, #tpu.memory_space<vmem>>, vector<1x8x1xf32>,
        %c1 = arith.constant 1 : index
        %c0_21 = arith.constant 0 : index
        %c0_22 = arith.constant 0 : index
        %38 = vector.load %arg7[%c1, %c0_21, %c0_22] : memref<2x8x1xf32, #tpu.memory_space<vmem>>, vector<1x8x1xf32>
        %39 = vector.shape_cast %38 : vector<1x8x1xf32> to vector<8x1xf32>
        %40 = arith.addf %39, %25 : vector<8x1xf32>
        %c1_23 = arith.constant 1 : index
        %c0_24 = arith.constant 0 : index
        %c0_25 = arith.constant 0 : index
        %41 = vector.load %arg7[%c1_23, %c0_24, %c0_25] : memref<2x8x1xf32, #tpu.memory_space<vmem>>, vector<1x8x1xf32>
        %42 = vector.shape_cast %41 : vector<1x8x1xf32> to vector<8x1xf32>
        %43 = vector.shape_cast %40 : vector<8x1xf32> to vector<1x8x1xf32>
        tpu.vector_store %arg7[%c1_23, %c0_24, %c0_25], %43 {strides = array<i32>} : memref<2x8x1xf32, #tpu.memory_space<vmem>>, vector<1x8x1xf32>,
      } else {
      }
    } else {
    }
    %c1_i32 = arith.constant 1 : i32
    %3 = arith.cmpi eq, %arg0, %c1_i32 : i32
    %4 = arith.extui %3 : i1 to i32
    %c0_i32_1 = arith.constant 0 : i32
    %5 = arith.cmpi ne, %4, %c0_i32_1 : i32
    scf.if %5 {
      %c0_i32_2 = arith.constant 0 : i32
      %6 = arith.cmpi eq, %arg1, %c0_i32_2 : i32
      %7 = arith.extui %6 : i1 to i32
      %c0_i32_3 = arith.constant 0 : i32
      %8 = arith.cmpi ne, %7, %c0_i32_3 : i32
      scf.if %8 {
        %c0_14 = arith.constant 0 : index
        %c0_15 = arith.constant 0 : index
        %c0_16 = arith.constant 0 : index
        %28 = vector.load %arg7[%c0_14, %c0_15, %c0_16] : memref<2x8x1xf32, #tpu.memory_space<vmem>>, vector<1x8x1xf32>
        %29 = vector.shape_cast %28 : vector<1x8x1xf32> to vector<8x1xf32>
        %cst_17 = arith.constant 0.001953125 : f32
        %30 = vector.broadcast %cst_17 : f32 to vector<8x1xf32>
        %31 = arith.mulf %29, %30 : vector<8x1xf32>
        %c1_18 = arith.constant 1 : index
        %c0_19 = arith.constant 0 : index
        %c0_20 = arith.constant 0 : index
        %32 = vector.load %arg7[%c1_18, %c0_19, %c0_20] : memref<2x8x1xf32, #tpu.memory_space<vmem>>, vector<1x8x1xf32>
        %33 = vector.shape_cast %32 : vector<1x8x1xf32> to vector<8x1xf32>
        %cst_21 = arith.constant 0.001953125 : f32
        %34 = vector.broadcast %cst_21 : f32 to vector<8x1xf32>
        %35 = arith.mulf %33, %34 : vector<8x1xf32>
        %36 = arith.mulf %31, %31 : vector<8x1xf32>
        %37 = arith.subf %35, %36 : vector<8x1xf32>
        %cst_22 = arith.constant 9.99999974E-6 : f32
        %38 = vector.broadcast %cst_22 : f32 to vector<8x1xf32>
        %39 = arith.addf %37, %38 : vector<8x1xf32>
        %40 = math.rsqrt %39 : vector<8x1xf32>
        %c0_23 = arith.constant 0 : index
        %c0_24 = arith.constant 0 : index
        %c0_25 = arith.constant 0 : index
        %41 = vector.load %arg8[%c0_23, %c0_24, %c0_25] : memref<2x8x1xf32, #tpu.memory_space<vmem>>, vector<1x8x1xf32>
        %42 = vector.shape_cast %41 : vector<1x8x1xf32> to vector<8x1xf32>
        %43 = vector.shape_cast %40 : vector<8x1xf32> to vector<1x8x1xf32>
        tpu.vector_store %arg8[%c0_23, %c0_24, %c0_25], %43 {strides = array<i32>} : memref<2x8x1xf32, #tpu.memory_space<vmem>>, vector<1x8x1xf32>,
        %c0_26 = arith.constant 0 : index
        %c0_27 = arith.constant 0 : index
        %44 = vector.load %arg4[%c0_26, %c0_27] : memref<8x1xf32, #tpu.memory_space<vmem>>, vector<8x1xf32>
        %45 = arith.mulf %31, %40 : vector<8x1xf32>
        %46 = arith.subf %44, %45 : vector<8x1xf32>
        %c1_28 = arith.constant 1 : index
        %c0_29 = arith.constant 0 : index
        %c0_30 = arith.constant 0 : index
        %47 = vector.load %arg8[%c1_28, %c0_29, %c0_30] : memref<2x8x1xf32, #tpu.memory_space<vmem>>, vector<1x8x1xf32>
        %48 = vector.shape_cast %47 : vector<1x8x1xf32> to vector<8x1xf32>
        %49 = vector.shape_cast %46 : vector<8x1xf32> to vector<1x8x1xf32>
        tpu.vector_store %arg8[%c1_28, %c0_29, %c0_30], %49 {strides = array<i32>} : memref<2x8x1xf32, #tpu.memory_space<vmem>>, vector<1x8x1xf32>,
      } else {
      }
      %9 = arith.index_cast %arg1 : i32 to index
      %c0 = arith.constant 0 : index
      %c0_4 = arith.constant 0 : index
      %10 = vector.load %arg6[%9, %c0, %c0_4] : memref<2x8x256xf32, #tpu.memory_space<vmem>>, vector<1x8x256xf32>
      %11 = vector.shape_cast %10 : vector<1x8x256xf32> to vector<8x256xf32>
      %c0_5 = arith.constant 0 : index
      %c0_6 = arith.constant 0 : index
      %c0_7 = arith.constant 0 : index
      %12 = vector.load %arg8[%c0_5, %c0_6, %c0_7] : memref<2x8x1xf32, #tpu.memory_space<vmem>>, vector<1x8x1xf32>
      %13 = vector.shape_cast %12 : vector<1x8x1xf32> to vector<8x1xf32>
      %14 = vector.broadcast %13 : vector<8x1xf32> to vector<8x256xf32>
      %15 = arith.mulf %11, %14 : vector<8x256xf32>
      %c1 = arith.constant 1 : index
      %c0_8 = arith.constant 0 : index
      %c0_9 = arith.constant 0 : index
      %16 = vector.load %arg8[%c1, %c0_8, %c0_9] : memref<2x8x1xf32, #tpu.memory_space<vmem>>, vector<1x8x1xf32>
      %17 = vector.shape_cast %16 : vector<1x8x1xf32> to vector<8x1xf32>
      %18 = vector.broadcast %17 : vector<8x1xf32> to vector<8x256xf32>
      %19 = arith.addf %15, %18 : vector<8x256xf32>
      %cst = arith.constant 0.000000e+00 : f32
      %20 = vector.broadcast %cst : f32 to vector<8x256xf32>
      %21 = arith.cmpf oge, %19, %20 : vector<8x256xf32>
      %cst_10 = arith.constant 0.00999999977 : f32
      %22 = vector.broadcast %cst_10 : f32 to vector<8x256xf32>
      %23 = arith.mulf %22, %19 : vector<8x256xf32>
      %24 = arith.select %21, %19, %23 : vector<8x256xi1>, vector<8x256xf32>
      %c0_11 = arith.constant 0 : index
      %c0_12 = arith.constant 0 : index
      %c0_13 = arith.constant 0 : index
      %25 = vector.load %arg5[%c0_11, %c0_12, %c0_13] : memref<1x8x256xf32, #tpu.memory_space<vmem>>, vector<1x8x256xf32>
      %26 = vector.shape_cast %25 : vector<1x8x256xf32> to vector<8x256xf32>
      %27 = vector.shape_cast %24 : vector<8x256xf32> to vector<1x8x256xf32>
      tpu.vector_store %arg5[%c0_11, %c0_12, %c0_13], %27 {strides = array<i32>} : memref<1x8x256xf32, #tpu.memory_space<vmem>>, vector<1x8x256xf32>,
    } else {
    }
    return
  }
  func.func @transform_0(%arg0: i32, %arg1: i32) -> (i32, i32, i32, i32) {
    %c1_i32 = arith.constant 1 : i32
    %0 = arith.subi %c1_i32, %arg0 : i32
    %1 = arith.muli %arg1, %0 : i32
    %c1_i32_0 = arith.constant 1 : i32
    %2 = arith.muli %c1_i32_0, %arg0 : i32
    %3 = arith.addi %1, %2 : i32
    %c0_i32 = arith.constant 0 : i32
    %c0_i32_1 = arith.constant 0 : i32
    %c0_i32_2 = arith.constant 0 : i32
    %c0_i32_3 = arith.constant 0 : i32
    return %c0_i32, %3, %c0_i32_1, %c0_i32_2 : i32, i32, i32, i32
  }
  func.func @transform_1(%arg0: i32, %arg1: i32) -> (i32, i32) {
    %c0_i32 = arith.constant 0 : i32
    %c0_i32_0 = arith.constant 0 : i32
    %c0_i32_1 = arith.constant 0 : i32
    return %c0_i32, %c0_i32_0 : i32, i32
  }
  func.func @transform_2(%arg0: i32, %arg1: i32) -> (i32, i32) {
    %c0_i32 = arith.constant 0 : i32
    %c0_i32_0 = arith.constant 0 : i32
    %c0_i32_1 = arith.constant 0 : i32
    return %c0_i32, %c0_i32_0 : i32, i32
  }
  func.func @transform_3(%arg0: i32, %arg1: i32) -> (i32, i32, i32) {
    %0 = arith.muli %arg1, %arg0 : i32
    %c0_i32 = arith.constant 0 : i32
    %c0_i32_0 = arith.constant 0 : i32
    %c0_i32_1 = arith.constant 0 : i32
    return %0, %c0_i32, %c0_i32_0 : i32, i32, i32
  }
}

</mosaic_0001>

<bundles_post_ra>
// kernel: tpu_custom_call.1
= control target key start
LH: loop header
LB: loop body
LE: loop exit
PB: predicated region body
PF: predicated region fallthrough
CT: control target
= control target key end

     0   :  { %8 = vsyncpa [#allocation6], 0  ;;  %s1090_s0 = inlined_call_operand.hbm [shape: bf16[3,2,4,288], index: 0, kind: input, shape index: {}]   ;;  %s1091_s1 = inlined_call_operand.vmem [shape: bf16[8,36], index: 1, kind: input, shape index: {}]   ;;  %s1092_s2 = inlined_call_operand.vmem [shape: f32[8,1], index: 2, kind: input, shape index: {}]   ;;  %s1093_s3 = inlined_call_operand.hbm [shape: f32[2,8,256], index: 3, kind: output, shape index: {}]  }
   0x1   :  { %10 = vsyncpa [#allocation6 + $0x1], 0 }
   0x2   :  { %11 = vsyncpa [#allocation7], 0 }
   0x3   :  { %13 = vsyncpa [#allocation7 + $0x1], 0  ;;  %s880_s12 = smov 0   ;;  %s882_s13 = smov 0  }
   0x4   :  { %s884_s14 = smov 0   ;;  %s886_s15 = smov 0  }
   0x5   :  { %s888_s16 = smov 0   ;;  %s890_s17 = smov 0  }
   0x6   :  { %s892_s18 = smov 0   ;;  %s894_s19 = smov 0  }
   0x7   :  { %s896_s20 = smov 0   ;;  %s898_s21 = smov 0  }
   0x8   :  { %s900_s22 = smov 0  }
   0x9 LB: > { %1098 = sst [smem:[#allocation11_spill]] %s844_s20  ;;  %s560_s23 = sadd.s32 4294967295, %s852_s22   ;;  %s852_s22 = sphi %s900_s22, %s19_s22   ;;  %s848_s21 = sphi %s898_s21, %s1112_s21   ;;  %s844_s20 = sphi %s896_s20, %s1111_s20   ;;  %s840_s19 = sphi %s894_s19, %s1110_s19   ;;  %s836_s18 = sphi %s892_s18, %s1109_s18   ;;  %s832_s17 = sphi %s890_s17, %s1118_s17   ;;  %s828_s16 = sphi %s888_s16, %s1117_s16   ;;  %s824_s15 = sphi %s886_s15, %s1116_s15   ;;  %s820_s14 = sphi %s884_s14, %s1115_s14   ;;  %s816_s13 = sphi %s882_s13, %s1114_s13   ;;  %s812_s12 = sphi %s880_s12, %s1113_s12  }
   0xa   : > { %1099 = sst [smem:[#allocation12_spill]] %s848_s21  ;;  %s28_s25 = sadd.s32 1, %s844_s20 }
   0xb   : > { %s31_s26 = sadd.s32 1, %s848_s21  ;;  %p29_p0 = scmp.ge.s32.totalorder %s28_s25, 2 }
   0xc   : > { %s35_s27 = ssub.s32 1, %s848_s21  ;;  %s44_s29 = sadd.s32 1, %s832_s17 }
   0xd   : > { %s36_s28 = smul.u32 %s844_s20, %s35_s27  ;;  %s1120_s25 = smov (%p29_p0, %s28_s25), 0 }
   0xe   : > { %1100 = sst [smem:[#allocation13_spill]] %s1120_s25  ;;  %s1122_s26 = smov (!%p29_p0, %s31_s26), %s848_s21 }
   0xf   : > { %s944_s30 = sadd.s32 %s848_s21, %s36_s28  ;;  %p51_p1 = scmp.ne.s32.totalorder %s832_s17, %s828_s16 }
  0x10   : > { %p33_p2 = scmp.ge.s32.totalorder %s1122_s26, 2  ;;  %p52_p3 = scmp.eq.s32.totalorder %s852_s22, 0 }
  0x11   : > { %p57_p4 = scmp.ne.s32.totalorder %s828_s16, %s824_s15  ;;  %p58_p5 = scmp.eq.s32.totalorder %s560_s23, 0 }
  0x12   : > { %s1124_s26 = smov (%p33_p2, %s1122_s26), 0  ;;  %p952_p6 = por %p52_p3, %p51_p1 }
  0x13   : > { %1101 = sst [smem:[#allocation14_spill]] %s1124_s26  ;;  %p956_p7 = por %p58_p5, %p57_p4 }
  0x14   : > { %s38_s6 = ssub.s32 1, %s1124_s26  ;;  %s109_s7 = smul.u32 %s844_s20, %s848_s21 }
  0x15   : > { %s39_s8 = smul.u32 %s38_s6, %s1120_s25  ;;  %s114_s9 = sadd.s32 1, %s820_s14 }
  0x16   : > { %s110_s10 = smul.u32 %s1124_s26, %s1120_s25  ;;  %p124_p8 = scmp.ne.s32.totalorder %s820_s14, %s816_s13 }
  0x17   : > { %s40_s11 = sadd.s32 %s39_s8, %s1124_s26  ;;  %p125_p9 = scmp.eq.s32.totalorder %s560_s23, 3 }
  0x18   : > { %s41_s15 = ssub.s32 %s944_s30, %s40_s11  ;;  %s111_s27 = ssub.s32 %s109_s7, %s110_s10 }
  0x19   : > { %p42_p10 = scmp.eq.s32.totalorder %s41_s15, 0  ;;  %p112_p11 = scmp.eq.s32.totalorder %s111_s27, 0 }
  0x1a   : > { %p971_p12 = por %p125_p9, %p124_p8  ;;  %p130_p13 = scmp.ne.s32.totalorder %s816_s13, %s812_s12 }
  0x1b   : > { %s978_s24 = scalar_select %p42_p10, %s832_s17, %s44_s29  }
  0x1c   : > { %s981_s6 = scalar_select %p112_p11, %s820_s14, %s114_s9  }
  0x1d   : > { %1105 = sst [smem:[#allocation15_spill]] %s978_s24  ;;  %s1106_s25 = sadd.s32 4294967294, %s852_s22  }
  0x1e   : > { %p131_p0 = scmp.eq.s32.totalorder %s1106_s25, 3  ;;  %p601_p1 = scmp.lt.s32.totalorder %s852_s22, 4 }
  0x1f   : > { %s157_s8 = sand.u32 1, %s832_s17   ;;  %s587_s10 = smul.u32 6, %s944_s30 }
  0x20   : > { %p987_p2 = por %p131_p0, %p130_p13  ;;  %s586_s7 = smul.u32 18, %s157_s8 }
  0x21   : > { %p594_p3 = pnand %p601_p1, %p952_p6  ;;  %s169_s29 = scalar_lea.hbm %s1090_s0, %s587_s10 }
  0x22   : > { %s161_s27 = scalar_lea.vmem [#allocation5], %s586_s7  ;;  %s170_s26 = sshll.u32 %s169_s29, 4  ;;  %s171_s26 = int_to_ptr.hbm [resolvable:$true] %s170_s26 }
  0x23   : > { %s172_s9 = sshll.u32 %s161_s27, 4  ;;  %p565_p4 = scmp.ge.s32.totalorder %s852_s22, 1  ;;  %s173_s9 = int_to_ptr.vmem [resolvable:$true] %s172_s9 }
  0x24   : > { %s158_s25 = scalar_lea.sflag [#allocation6], %s157_s8  ;;  %s854_s21 = smov 192  }
  0x25   : > { %s855_s20 = smov 96   ;;  %s856_s24 = smov 6  }
  0x26   : > { %596 = dma.hbm_to_vmem [thread:$0]  (!%p594_p3), %s171_s26, 288, %s173_s9, %s158_s25, %s854_s21, %s855_s20, %s856_s24  }
  0x27   : > { %p180_p5 = scmp.lt.s32.totalorder %s852_s22, 5 }
  0x29   : > { %p181_p8 = pnand %p565_p4, %p180_p5 }
  0x2a   : > { %s186_s30 = sand.u32 (!%p181_p8), 1, %s828_s16  }
  0x2b   : > { %184 = sbr.rel (%p181_p8) target bundleno = 677 (0x2a5), region = 32  ;;  %s187_s11 = scalar_lea.sflag (!%p181_p8), [#allocation6], %s186_s30 }
  0x2c   : > { %s588_s4 = smul.u32 (!%p181_p8), 18, %s186_s30 }
  0x2e   : > { %s190_s10 = scalar_lea.vmem (!%p181_p8), [#allocation5], %s588_s4 }
  0x30   : > { %803 = dma.done.wait (%p956_p7), %s187_s11, 288  }
  0x31   : > { %805 = vsyncadd (%p956_p7), %s187_s11, 4294967008  ;;  %s211_s8 = sand.u32 1, %s816_s13   ;;  %p567_p6 = scmp.ne.s32.totalorder %s840_s19, 0 }
  0x32   : > { %s566_s7 = sshll.u32 %s211_s8, 4  ;;  %s857_s21 = smov (!%p567_p6), 112  }
  0x33   : > { %s1007_s20 = scalar_lea.vmem [#allocation8], %s566_s7  ;;  %222 = sbr.rel (%p567_p6) target bundleno = 483 (0x1e3), region = 40 }
  0x34   : > { %s858_s24 = smov (!%p567_p6), 96   ;;  %s583_s15 = sshll.u32 (!%p567_p6), %s836_s18, 4 }
  0x35   : > { %s362_s29 = scalar_lea.vmem (!%p567_p6), [#allocation2], %s583_s15  ;;  %p572_p7 = scmp.ne.s32.totalorder (!%p567_p6), %s836_s18, 0 }
  0x38   : > { %v224_v0 = vld [vmem:[%s190_s10 + $0x6] sm:$0x3f]  ;;  %v225_v1 = vld [vmem:[%s190_s10 + $0xc] sm:$0x3f]  ;;  %v223_v2 = vld [vmem:[%s190_s10] sm:$0x3f] }
  0x39   : > { %233 = vst [vmem:[#allocation1 + $0x2] ss:$4 sm:$0xff] %v225_v1  ;;  %vm301_vm0 = vcmask 785408   ;;  %vm327_vm1 = vcmask 1041408   ;;  %vm266_vm2 = vcmask 916480   ;;  %vm313_vm3 = vcmask 1043456  }
  0x3a   : > { %239 = vst [vmem:[#allocation1 + $0x20] ss:$4 sm:$0xff] %v224_v0  ;;  %vm306_vm4 = vcmask 1045504   ;;  %v322_v40 = vld [vmem:[%s1091_s1] sm:$0xf]  ;;  %vm323_vm5 = vcmask 293888  }
  0x3b   : > { %241 = vst [vmem:[#allocation1 + $0x21] ss:$4 sm:$0xff] %v225_v1 }
  0x3c   : > { %227 = vst [vmem:[#allocation1] ss:$4 sm:$0xff] %v223_v2 }
  0x3d   : > { %230 = vst [vmem:[#allocation1 + $0x1] ss:$4 sm:$0xff] %v224_v0 }
  0x42   : > { %v248_v3 = vld.sshfl [vmem:[#allocation1 + $0x20] sm:$0xff pattern:$0x73625140]  ;;  %v250_v4 = vld.sshfl [vmem:[#allocation1 + $0x28] sm:$0xff pattern:$0x73625140] }
  0x43   : > { %v252_v5 = vld.sshfl [vmem:[#allocation1 + $0x30] sm:$0xff pattern:$0x73625140]  ;;  %260 = vrot.lane.b32.xlu1 %v248_v3, %s857_s21  ;;  %262 = vrot.lane.b32.xlu2 %v250_v4, %s857_s21 }
  0x44   : > { %v1010_v6 = vld.sshfl [vmem:[#allocation1] sm:$0xff pattern:$0x73625140]  ;;  %v235_v7 = vld.sshfl [vmem:[#allocation1 + $0x8] sm:$0xff pattern:$0x73625140] }
  0x45   : > { %237 = vst [vmem:[#allocation1 + $0x3] ss:$4 sm:$0xff] %v223_v2 }
  0x46   : > { %276 = vst [vmem:[#allocation1 + $0x20] ss:$4 sm:$0xff] %v225_v1 }
  0x4b   : > { %264 = vrot.lane.b32.xlu2 %v252_v5, %s857_s21 }
  0x4c   : > { %v242_v8 = vld.sshfl [vmem:[#allocation1] sm:$0xff pattern:$0x73625140]  ;;  %v244_v9 = vld.sshfl [vmem:[#allocation1 + $0x8] sm:$0xff pattern:$0x73625140] }
  0x4d   : > { %v246_v10 = vld.sshfl [vmem:[#allocation1 + $0x10] sm:$0xff pattern:$0x73625140]  ;;  %v283_v12 = vld.sshfl [vmem:[#allocation1 + $0x20] sm:$0xff pattern:$0x73625140] }
  0x4e   : > { %v287_v11 = vld.sshfl [vmem:[#allocation1 + $0x30] sm:$0xff pattern:$0x73625140]  ;;  %272 = vst [vmem:[#allocation1 + $0x2] ss:$4 sm:$0xff] %v223_v2  ;;  %295 = vrot.lane.b32.xlu0 %v283_v12, %s858_s24 }
  0x4f   : > { %299 = vrot.lane.b32.xlu1 %v287_v11, %s858_s24  ;;  %274 = vst [vmem:[#allocation1 + $0x3] ss:$4 sm:$0xff] %v224_v0  ;;  %v285_v13 = vld.sshfl [vmem:[#allocation1 + $0x28] sm:$0xff pattern:$0x73625140] }
  0x56   : > { %v279_v14 = vld.sshfl [vmem:[#allocation1 + $0x8] sm:$0xff pattern:$0x73625140]  ;;  %297 = vrot.lane.b32.xlu0 %v285_v13, %s858_s24  ;;  %v281_v15 = vld.sshfl [vmem:[#allocation1 + $0x10] sm:$0xff pattern:$0x73625140] }
  0x57   : > { %291 = vrot.lane.b32.xlu1 %v279_v14, %s858_s24  ;;  %293 = vrot.lane.b32.xlu2 %v281_v15, %s858_s24  ;;  %v277_v16 = vld.sshfl [vmem:[#allocation1] sm:$0xff pattern:$0x73625140] }
  0x5e   : > { %289 = vrot.lane.b32.xlu0 %v277_v16, %s858_s24 }
  0x5f   : > { %256 = vrot.lane.b32.xlu1 %v244_v9, %s857_s21  ;;  %258 = vrot.lane.b32.xlu2 %v246_v10, %s857_s21 }
  0x66   : > { %254 = vrot.lane.b32.xlu0 %v242_v8, %s857_s21 }
  0x9d   : > { %v263_v17 = vpop.permute.xlu2 %262 }
  0xa5   : > { %v265_v19 = vpop.permute.xlu2 %264 }
  0xa6   : > { %v270_v30 = vsel %vm266_vm2, %v263_v17, %v265_v19 }
  0xb1   : > { %v294_v22 = vpop.permute.xlu2 %293 }
  0xb5   : > { %v261_v18 = vpop.permute.xlu1 %260 }
  0xb6   : > { %v269_v35 = vsel %vm266_vm2, %v261_v18, %v263_v17 }
  0xb9   : > { %v259_v32 = vpop.permute.xlu2 %258 }
  0xc0   : > { %v296_v21 = vpop.permute.xlu0 %295 }
  0xc1   : > { %v300_v20 = vpop.permute.xlu1 %299 }
  0xc8   : > { %v298_v23 = vpop.permute.xlu0 %297 }
  0xc9   : > { %v292_v24 = vpop.permute.xlu1 %291  ;;  %v304_v25 = vsel %vm301_vm0, %v296_v21, %v298_v23  ;;  %v305_v26 = vsel %vm301_vm0, %v298_v23, %v300_v20 }
  0xca   : > { %v329_v27 = vsel %vm327_vm1, %v304_v25, 0  ;;  %v332_v28 = vsel %vm327_vm1, %v305_v26, 0  ;;  %v303_v29 = vsel %vm301_vm0, %v292_v24, %v294_v22 }
  0xcb   : > { %339 = vmatpush.bf16.msra.mxu0 %v329_v27  ;;  %352 = vmatpush.bf16.msra.mxu1 %v332_v28  ;;  %v320_v31 = vsel %vm313_vm3, %v270_v30, %v303_v29 }
  0xcf   : > { %353 = vmatpush.bf16.msra.mxu1 %v320_v31 }
  0xd0   : > { %v290_v34 = vpop.permute.xlu0 %289 }
  0xd1   : > { %v257_v33 = vpop.permute.xlu1 %256  ;;  %v302_v37 = vsel %vm301_vm0, %v290_v34, %v292_v24 }
  0xd2   : > { %v268_v36 = vsel %vm266_vm2, %v257_v33, %v259_v32  ;;  %v316_v38 = vsel %vm313_vm3, %v269_v35, %v302_v37 }
  0xd3   : > { %v311_v39 = vsel %vm306_vm4, %v235_v7, %v268_v36  ;;  %340 = vmatpush.bf16.msra.mxu0 %v316_v38 }
  0xd4   : > { %354 = vmatpush.bf16.msra.mxu1 %v311_v39 }
  0xd7   : > { %569 = vmatmul.msk.bf16.vlgmr.msra.gmra.mxu1 %vm323_vm5, %v322_v40 }
  0xd8   : > { %v255_v41 = vpop.permute.xlu0 %254 }
  0xd9   : > { %v267_v42 = vsel %vm266_vm2, %v255_v41, %v257_v33 }
  0xda   : > { %v308_v43 = vsel %vm306_vm4, %v1010_v6, %v267_v42 }
  0xdb   : > { %341 = vmatpush.bf16.msra.mxu0 %v308_v43 }
  0xde   : > { %568 = vmatmul.msk.bf16.vlgmr.msra.gmra.mxu0 %vm323_vm5, %v322_v40 }
 0x154   : > { %v356_v44 = vpop.f32.mrf.mxu1 }
 0x155   : > { %364 = vst [vmem:[%s362_s29 + $0x8] sm:$0xff] %v356_v44  ;;  %v369_v45 = vmul.f32 %v356_v44, %v356_v44 }
 0x15b   : > { %v343_v46 = vpop.f32.mrf.mxu0 }
 0x15c   : > { %v358_v47 = vpop.f32.mrf.mxu1  ;;  %363 = vst [vmem:[%s362_s29] sm:$0xff] %v343_v46  ;;  %v365_v48 = vadd.f32 %v356_v44, %v343_v46  ;;  %v368_v49 = vmul.f32 %v343_v46, %v343_v46 }
 0x15e   : > { %366 = vadd.xlane.f32.xlu0 %v365_v48  ;;  %v370_v50 = vadd.f32 %v369_v45, %v368_v49 }
 0x160   : > { %371 = vadd.xlane.f32.xlu1 %v370_v50 }
 0x163   : > { %v345_v51 = vpop.f32.mrf.mxu0 }
 0x1cf   : > { %376 = sbr.rel (%p572_p7) target bundleno = 471 (0x1d7), region = 44 }
 0x1d1   : > { %v367_v52 = vpop.xlane.xlu0 %366 }
 0x1d3   : > { %v372_v53 = vpop.xlane.xlu1 %371 }
 0x1d4   : > { %vm377_vm6 = vcmask 7168  }
 0x1d5   : > { %378 = vst.msk [vmem:[#allocation3] sm:$0xff] %vm377_vm6, %v367_v52 }
 0x1d6   : > { %380 = vst.msk [vmem:[#allocation3 + $0x8] sm:$0xff] %vm377_vm6, %v372_v53 }
 0x1d7 PF: > { %p573_p9 = scmp.eq.s32.totalorder %s836_s18, 0 }
 0x1d9   : > { %384 = sbr.rel (%p573_p9) target bundleno = 483 (0x1e3), region = 48 }
 0x1de   : > { %v385_v54 = vld [vmem:[#allocation3] sm:$0xff]  ;;  %vm387_vm7 = vcmask 7168   ;;  %v390_v55 = vld [vmem:[#allocation3 + $0x8] sm:$0xff] }
 0x1df   : > { %v386_v56 = vadd.f32 %v385_v54, %v367_v52  ;;  %v391_v57 = vadd.f32 %v390_v55, %v372_v53 }
 0x1e1   : > { %388 = vst.msk [vmem:[#allocation3] sm:$0xff] %vm387_vm7, %v386_v56 }
 0x1e2   : > { %392 = vst.msk [vmem:[#allocation3 + $0x8] sm:$0xff] %vm387_vm7, %v391_v57 }
 0x1e3 PF: > { %p574_p10 = scmp.ne.s32.totalorder %s840_s19, 1 }
 0x1e4   : > { %p575_p11 = scmp.ne.s32.totalorder (!%p574_p10), %s836_s18, 0 }
 0x1e5   : > { %396 = sbr.rel (%p574_p10) target bundleno = 660 (0x294), region = 52 }
 0x1ea   : > { %400 = sbr.rel (%p575_p11) target bundleno = 527 (0x20f), region = 56 }
 0x1ef   : > { %v401_v58 = vld [vmem:[#allocation3] sm:$0xff]  ;;  %v404_v59 = vld [vmem:[#allocation3 + $0x8] sm:$0xff]  ;;  %vm419_vm11 = vcmask 7168   ;;  %v421_v8 = vld [vmem:[%s1092_s2] sm:$0xff] }
 0x1f0   : > { %v402_v60 = vmul.f32 0.001953125, %v401_v58  ;;  %v405_v61 = vmul.f32 0.001953125, %v404_v59 }
 0x1f2   : > { %v406_v62 = vmul.f32 %v402_v60, %v402_v60 }
 0x1f4   : > { %v407_v63 = vsub.f32 %v405_v61, %v406_v62 }
 0x1f6   : > { %v408_v0 = vadd.f32 1e-05, %v407_v63 }
 0x1f8   : > { %697 = vrsqrt.f32 %v408_v0  ;;  %vm415_vm8 = vweird.f32 %v408_v0 }
 0x1fe   : > { %v698_v1 = vpop.eup %697 }
 0x1ff   : > { %v410_v2 = vmul.f32 %v698_v1, %v408_v0  ;;  %vm416_vm9 = vweird.f32 %v698_v1 }
 0x200   : > { %vm417_vm10 = vmor %vm415_vm8, %vm416_vm9 }
 0x201   : > { %v411_v3 = vmul.f32 %v698_v1, %v410_v2 }
 0x203   : > { %v412_v4 = vmul.f32 0.5, %v411_v3 }
 0x205   : > { %v413_v5 = vsub.f32 1.5, %v412_v4 }
 0x207   : > { %v414_v6 = vmul.f32 %v698_v1, %v413_v5 }
 0x209   : > { %v418_v7 = vsel %vm417_vm10, %v698_v1, %v414_v6 }
 0x20a   : > { %420 = vst.msk [vmem:[#allocation4] sm:$0xff] %vm419_vm11, %v418_v7  ;;  %v422_v9 = vmul.f32 %v418_v7, %v402_v60 }
 0x20c   : > { %v423_v10 = vsub.f32 %v421_v8, %v422_v9 }
 0x20e   : > { %425 = vst.msk [vmem:[#allocation4 + $0x8] sm:$0xff] %vm419_vm11, %v423_v10 }
 0x20f PF: > { %v859_v12 = vmov 0   ;;  %s584_s25 = sshll.u32 %s836_s18, 4 }
 0x210   : > { %699 = vset.pattern.permute.xlu0 %v859_v12  ;;  %s428_s30 = scalar_lea.vmem [#allocation2], %s584_s25 }
 0x211   : > { %v431_v11 = vld [vmem:[#allocation4] sm:$0xff]  ;;  %v429_v15 = vld [vmem:[%s428_s30] sm:$0xff]  ;;  %v430_v16 = vld [vmem:[%s428_s30 + $0x8] sm:$0xff] }
 0x212   : > { %434 = vperm.xlu0 %699, %v431_v11  }
 0x215   : > { %v440_v13 = vld [vmem:[#allocation4 + $0x8] sm:$0xff] }
 0x21a   : > { %443 = vperm.xlu0 %699, %v440_v13  }
 0x284   : > { %v435_v14 = vpop.permute.xlu0 %434 }
 0x285   : > { %v437_v17 = vmul.f32 %v435_v14, %v429_v15  ;;  %v438_v18 = vmul.f32 %v435_v14, %v430_v16 }
 0x28c   : > { %v444_v19 = vpop.permute.xlu0 %443 }
 0x28d   : > { %v446_v20 = vadd.f32 %v444_v19, %v437_v17  ;;  %v447_v21 = vadd.f32 %v444_v19, %v438_v18 }
 0x28f   : > { %vm448_vm12 = vcmp.ge.f32.partialorder %v446_v20, 0.0  ;;  %vm449_vm13 = vcmp.ge.f32.partialorder %v447_v21, 0.0  ;;  %v450_v22 = vmul.f32 0.01, %v446_v20  ;;  %v451_v23 = vmul.f32 0.01, %v447_v21 }
 0x291   : > { %v452_v24 = vsel %vm448_vm12, %v446_v20, %v450_v22  ;;  %v453_v25 = vsel %vm449_vm13, %v447_v21, %v451_v23 }
 0x292   : > { %454 = vst [vmem:[%s1007_s20] sm:$0xff] %v452_v24 }
 0x293   : > { %455 = vst [vmem:[%s1007_s20 + $0x8] sm:$0xff] %v453_v25 }
 0x294 PF: > { %s464_s4 = smul.u32 %s836_s18, %s840_s19  ;;  %s471_s11 = sshll.u32 %s1007_s20, 4  ;;  %s472_s11 = int_to_ptr.vmem [resolvable:$true] %s471_s11 }
 0x295   : > { %s457_s5 = scalar_lea.sflag [#allocation7], %s211_s8  ;;  %s750_s19 = scalar_lea.hbm %s1093_s3, 32 }
 0x296   : > { %s585_s10 = sshll.u32 %s464_s4, 4 }
 0x297   : > { %s469_s24 = scalar_lea.hbm %s1093_s3, %s585_s10 }
 0x298   : > { %s473_s26 = sshll.u32 %s469_s24, 4  ;;  %s474_s26 = int_to_ptr.hbm [resolvable:$true] %s473_s26 }
 0x299   : > { %s744_s15 = sshra.s32 %s474_s26, 4  ;;  %s745_s15 = int_to_ptr.hbm [resolvable:$true] %s744_s15 }
 0x29a   : > { %s746_s29 = scalar_lea.hbm %s745_s15, 16  ;;  %p751_p3 = scmp.lt.s32.totalorder %s745_s15, %s1093_s3 }
 0x29b   : > { %p747_p13 = scmp.ne.s32.totalorder %s745_s15, %s746_s29  ;;  %p752_p4 = scmp.lt.s32.totalorder %s750_s19, %s746_s29 }
 0x29d   : > { %p748_p0 = pnand %p747_p13, %p971_p12  ;;  %p753_p5 = por %p752_p4, %p751_p3 }
 0x29f   : > { %p749_p1 = pneg %p748_p0 }
 0x2a1   : > { %p754_p8 = pnand %p753_p5, %p749_p1 }
 0x2a3   : > { %757 = shalt.err (!%p754_p8)
}
 0x2a4   : > { %591 = dma.vmem_to_hbm [thread:$0]  (%p971_p12), %s472_s11, 256, %s474_s26, %s457_s5  }
 0x2a5 PF: > { %p602_p6 = scmp.ge.s32.totalorder %s852_s22, 2  ;;  %s485_s8 = sand.u32 1, %s812_s12  }
 0x2a6   : > { %s486_s25 = scalar_lea.sflag [#allocation7], %s485_s8 }
 0x2a7   : > { %p598_p7 = pnand %p602_p6, %p987_p2 }
 0x2a9   : > { %p599_p9 = pneg %p598_p7 }
 0x2ab   : > { %807 = dma.done.wait (%p599_p9), %s486_s25, 256  }
 0x2ac   : > { %809 = vsyncadd (%p599_p9), %s486_s25, 4294967040  ;;  %s19_s22 = sadd.s32 1, %s852_s22   ;;  %s1108_s28 = sld [smem:[#allocation15_spill]] }
 0x2ad   : > { %p16_p10 = scmp.ge.s32.totalorder %s19_s22, 6   ;;  %s1109_s18 = sld [smem:[#allocation11_spill]] }
 0x2ae   : > { %s1110_s19 = sld [smem:[#allocation12_spill]]  ;;  %s1113_s12 = smov %s816_s13 }
 0x2af   : > { %s1111_s20 = sld [smem:[#allocation13_spill]]  ;;  %s1114_s13 = smov %s820_s14 }
 0x2b0   : > { %s1112_s21 = sld [smem:[#allocation14_spill]]  ;;  %s1115_s14 = smov %s981_s6 }
 0x2b1   : > { %s1116_s15 = smov %s828_s16  ;;  %s1117_s16 = smov %s832_s17 }
 0x2b2   : > { %s1118_s17 = smov %s1108_s28  ;;  %18 = sbr.rel (!%p16_p10) target bundleno = 9 (0x9), region = 112 }
 0x2b7   :  { %492 = vsyncpa [#allocation6], 1 }
 0x2b8   :  { %494 = vsyncpa [#allocation6 + $0x1], 1 }
 0x2b9   :  { %495 = vsyncpa [#allocation7], 1 }
 0x2ba   :  { %497 = vsyncpa [#allocation7 + $0x1], 1 }

</bundles_post_ra>
